<compile_context>
chip_gen: v7x
topology: tpu7x:2x2x1
jax: 0.10.0
libtpu: 0.0.40
codegen_flags: <defaults>
</compile_context>

<pallas_src>
import functools
import math

import jax
import jax.numpy as jnp
from jax import lax
from jax.experimental import pallas as pl
from jax.experimental.pallas import tpu as pltpu


def _attn_kernel(x1_ref, x2_ref, u_ref, wq_ref, wkv_ref, o_ref,
                 *, bt, lq, lk, dout, inv_scale, dropout_p):
    # --- fused, batched projections (big lane-dense 2-D matmuls on the MXU) ---
    # q is pre-scaled by 1/sqrt(input_dim): (q/s) @ k^T == (q @ k^T)/s.
    q = jnp.dot(x1_ref[...], wq_ref[...],
                preferred_element_type=jnp.float32) * inv_scale        # (Bt*Lq, Dout)
    kv = jnp.dot(x2_ref[...], wkv_ref[...],
                 preferred_element_type=jnp.float32)                   # (Bt*Lk, 2*Dout)
    k = kv[:, :dout]
    v = kv[:, dout:]

    keep_scale = 1.0 / (1.0 - dropout_p) if dropout_p > 0.0 else 1.0

    outs = []
    for b in range(bt):  # static unroll over the per-step batch block (Bt is small)
        qb = q[b * lq:(b + 1) * lq, :]                                  # (Lq, Dout)
        kb = k[b * lk:(b + 1) * lk, :]                                  # (Lk, Dout)
        vb = v[b * lk:(b + 1) * lk, :]                                  # (Lk, Dout)

        # q @ k^T without materializing a transpose: contract last axes of both.
        s = lax.dot_general(qb, kb, (((1,), (1,)), ((), ())),
                            preferred_element_type=jnp.float32)        # (Lq, Lk)

        # numerically stable softmax along the key axis
        s = s - jnp.max(s, axis=-1, keepdims=True)
        e = jnp.exp(s)
        inv_den = 1.0 / jnp.sum(e, axis=-1, keepdims=True)              # (Lq, 1)
        p = e * inv_den

        if dropout_p > 0.0:
            u = u_ref[b * lq:(b + 1) * lq, :]                           # (Lq, Lk) uniforms
            p = jnp.where(u >= dropout_p, p * keep_scale, 0.0)

        outs.append(jnp.dot(p, vb, preferred_element_type=jnp.float32))  # (Lq, Dout)

    o_ref[...] = jnp.concatenate(outs, axis=0).astype(o_ref.dtype)


def attention_forward(x1, x2, wq, wk, wv, dropout_key, dropout_p=0.1, batch_block=None):
    """x1: (B, Lq, Din), x2: (B, Lk, Din), wq/wk/wv: (Din, Dout) (transposed nn.Linear)."""
    B, Lq, Din = x1.shape
    _, Lk, _ = x2.shape
    Dout = wq.shape[1]

    # Matches the reference Model: scale_factor = sqrt(input_dim) (intentional, per spec).
    inv_scale = 1.0 / math.sqrt(float(Din))

    if dropout_p >= 1.0:
        # F.dropout with p == 1 zeroes everything.
        return jnp.zeros((B, Lq, Dout), jnp.float32)

    # Batches processed per grid step.
    if batch_block is None:
        batch_block = min(B, 8)
    while B % batch_block:
        batch_block -= 1
    bt = batch_block

    # Lane-dense 2-D slabs for the kernel.
    x1_2d = x1.reshape(B * Lq, Din)
    x2_2d = x2.reshape(B * Lk, Din)
    wkv = jnp.concatenate([wk, wv], axis=1)                             # (Din, 2*Dout)

    # Dropout uniforms generated host-side (distribution-equivalent to F.dropout).
    if dropout_p > 0.0:
        u = jax.random.uniform(dropout_key, (B * Lq, Lk), jnp.float32)
    else:
        u = jnp.zeros((B * Lq, Lk), jnp.float32)

    kernel = functools.partial(
        _attn_kernel, bt=bt, lq=Lq, lk=Lk, dout=Dout,
        inv_scale=inv_scale, dropout_p=float(dropout_p))

    out_2d = pl.pallas_call(
        kernel,
        out_shape=jax.ShapeDtypeStruct((B * Lq, Dout), jnp.float32),
        grid_spec=pltpu.PrefetchScalarGridSpec(
            num_scalar_prefetch=0,
            grid=(B // bt,),
            in_specs=[
                pl.BlockSpec((bt * Lq, Din), lambda i: (i, 0)),         # x1 slab
                pl.BlockSpec((bt * Lk, Din), lambda i: (i, 0)),         # x2 slab
                pl.BlockSpec((bt * Lq, Lk), lambda i: (i, 0)),          # dropout uniforms
                pl.BlockSpec((Din, Dout), lambda i: (0, 0)),            # wq (resident)
                pl.BlockSpec((Din, 2 * Dout), lambda i: (0, 0)),        # [wk | wv] (resident)
            ],
            out_specs=pl.BlockSpec((bt * Lq, Dout), lambda i: (i, 0)),
        ),
        compiler_params=pltpu.CompilerParams(
            dimension_semantics=("parallel",)),                         # batch blocks independent
    )(x1_2d, x2_2d, u, wq, wkv)

    return out_2d.reshape(B, Lq, Dout)


if __name__ == "__main__":
    # Small shapes consistent with the module's forward:
    #   x1: (B, Lq, D_in), x2: (B, Lk, D_in), Linear(D_in -> D_out, bias=False)
    B, Lq, Lk, D_in, D_out = 2, 8, 16, 256, 128
    dropout_p = 0.1

    key = jax.random.PRNGKey(0)
    k_x1, k_x2, k_wq, k_wk, k_wv, k_drop = jax.random.split(key, 6)

    x1 = jax.random.normal(k_x1, (B, Lq, D_in), dtype=jnp.float32)
    x2 = jax.random.normal(k_x2, (B, Lk, D_in), dtype=jnp.float32)

    # Deterministic stand-in for nn.Linear weights, stored as (D_in, D_out).
    bound = 1.0 / math.sqrt(D_in)
    wq = jax.random.uniform(k_wq, (D_in, D_out), jnp.float32, -bound, bound)
    wk = jax.random.uniform(k_wk, (D_in, D_out), jnp.float32, -bound, bound)
    wv = jax.random.uniform(k_wv, (D_in, D_out), jnp.float32, -bound, bound)

    out = attention_forward(x1, x2, wq, wk, wv, k_drop, dropout_p=dropout_p)
    out = jax.block_until_ready(out)

    assert out.shape == (B, Lq, D_out)
    assert bool(jnp.all(jnp.isfinite(out)))
    print("KERNEL_OK")
</pallas_src>

<mosaic_0001>
module attributes {stable_mosaic.version = 11 : i64} {
  func.func @_attn_kernel(%arg0: i32, %arg1: memref<16x256xf32, #tpu.memory_space<vmem>>, %arg2: memref<32x256xf32, #tpu.memory_space<vmem>>, %arg3: memref<16x16xf32, #tpu.memory_space<vmem>>, %arg4: memref<256x128xf32, #tpu.memory_space<vmem>>, %arg5: memref<256x256xf32, #tpu.memory_space<vmem>>, %arg6: memref<16x128xf32, #tpu.memory_space<vmem>>) attributes {dimension_semantics = [#tpu.dimension_semantics<parallel>], iteration_bounds = array<i64: 1>, scalar_prefetch = 0 : i64, scratch_operands = 0 : i64, tpu.core_type = #tpu.core_type<tc>, window_params = [{transform_indices = @transform_0, window_bounds = array<i64: 16, 256>}, {transform_indices = @transform_1, window_bounds = array<i64: 32, 256>}, {transform_indices = @transform_2, window_bounds = array<i64: 16, 16>}, {pipeline_mode = #tpu.pipeline_mode<synchronous>, transform_indices = @transform_3, window_bounds = array<i64: 256, 128>}, {pipeline_mode = #tpu.pipeline_mode<synchronous>, transform_indices = @transform_4, window_bounds = array<i64: 256, 256>}, {transform_indices = @transform_5, window_bounds = array<i64: 16, 128>}]} {
    %c0 = arith.constant 0 : index
    %c0_0 = arith.constant 0 : index
    %0 = vector.load %arg1[%c0, %c0_0] : memref<16x256xf32, #tpu.memory_space<vmem>>, vector<16x256xf32>
    %c0_1 = arith.constant 0 : index
    %c0_2 = arith.constant 0 : index
    %1 = vector.load %arg4[%c0_1, %c0_2] : memref<256x128xf32, #tpu.memory_space<vmem>>, vector<256x128xf32>
    %cst = arith.constant dense<0.000000e+00> : vector<16x128xf32>
    %2 = tpu.matmul %0, %1, %cst {dimension_numbers = #tpu.dot_dimension_numbers<[1], [0], [0], [1], [0, 0, 1, 1], [], []>} : vector<16x256xf32>, vector<256x128xf32>, vector<16x128xf32> -> vector<16x128xf32>
    %cst_3 = arith.constant 6.250000e-02 : f32
    %3 = vector.broadcast %cst_3 : f32 to vector<16x128xf32>
    %4 = arith.mulf %2, %3 : vector<16x128xf32>
    %c0_4 = arith.constant 0 : index
    %c0_5 = arith.constant 0 : index
    %5 = vector.load %arg2[%c0_4, %c0_5] : memref<32x256xf32, #tpu.memory_space<vmem>>, vector<32x256xf32>
    %c0_6 = arith.constant 0 : index
    %c0_7 = arith.constant 0 : index
    %6 = vector.load %arg5[%c0_6, %c0_7] : memref<256x256xf32, #tpu.memory_space<vmem>>, vector<256x256xf32>
    %cst_8 = arith.constant dense<0.000000e+00> : vector<32x256xf32>
    %7 = tpu.matmul %5, %6, %cst_8 {dimension_numbers = #tpu.dot_dimension_numbers<[1], [0], [0], [1], [0, 0, 1, 1], [], []>} : vector<32x256xf32>, vector<256x256xf32>, vector<32x256xf32> -> vector<32x256xf32>
    %8 = vector.extract_strided_slice %7 {offsets = [0, 0], sizes = [32, 128], strides = [1, 1]} : vector<32x256xf32> to vector<32x128xf32>
    %9 = vector.extract_strided_slice %7 {offsets = [0, 128], sizes = [32, 128], strides = [1, 1]} : vector<32x256xf32> to vector<32x128xf32>
    %10 = vector.extract_strided_slice %4 {offsets = [0, 0], sizes = [8, 128], strides = [1, 1]} : vector<16x128xf32> to vector<8x128xf32>
    %11 = vector.extract_strided_slice %8 {offsets = [0, 0], sizes = [16, 128], strides = [1, 1]} : vector<32x128xf32> to vector<16x128xf32>
    %12 = vector.extract_strided_slice %9 {offsets = [0, 0], sizes = [16, 128], strides = [1, 1]} : vector<32x128xf32> to vector<16x128xf32>
    %cst_9 = arith.constant dense<0.000000e+00> : vector<8x16xf32>
    %13 = tpu.matmul %10, %11, %cst_9 {dimension_numbers = #tpu.dot_dimension_numbers<[1], [1], [0], [0], [0, 0, 1, 0], [], []>} : vector<8x128xf32>, vector<16x128xf32>, vector<8x16xf32> -> vector<8x16xf32>
    %cst_10 = arith.constant dense<0xFF800000> : vector<8xf32>
    %14 = vector.multi_reduction <maximumf>, %13, %cst_10 [1] : vector<8x16xf32> to vector<8xf32>
    %15 = vector.shape_cast %14 : vector<8xf32> to vector<8x1xf32>
    %16 = vector.broadcast %15 : vector<8x1xf32> to vector<8x16xf32>
    %17 = arith.subf %13, %16 : vector<8x16xf32>
    %18 = math.exp %17 : vector<8x16xf32>
    %cst_11 = arith.constant dense<0.000000e+00> : vector<8xf32>
    %19 = vector.multi_reduction <add>, %18, %cst_11 [1] : vector<8x16xf32> to vector<8xf32>
    %20 = vector.shape_cast %19 : vector<8xf32> to vector<8x1xf32>
    %cst_12 = arith.constant 1.000000e+00 : f32
    %21 = vector.broadcast %cst_12 : f32 to vector<8x1xf32>
    %22 = arith.divf %21, %20 : vector<8x1xf32>
    %23 = vector.broadcast %22 : vector<8x1xf32> to vector<8x16xf32>
    %24 = arith.mulf %18, %23 : vector<8x16xf32>
    %c0_13 = arith.constant 0 : index
    %c0_14 = arith.constant 0 : index
    %25 = vector.load %arg3[%c0_13, %c0_14] : memref<16x16xf32, #tpu.memory_space<vmem>>, vector<8x16xf32>
    %cst_15 = arith.constant 1.000000e-01 : f32
    %26 = vector.broadcast %cst_15 : f32 to vector<8x16xf32>
    %27 = arith.cmpf oge, %25, %26 : vector<8x16xf32>
    %cst_16 = arith.constant 1.11111116 : f32
    %28 = vector.broadcast %cst_16 : f32 to vector<8x16xf32>
    %29 = arith.mulf %24, %28 : vector<8x16xf32>
    %cst_17 = arith.constant 0.000000e+00 : f32
    %30 = vector.broadcast %cst_17 : f32 to vector<8x16xf32>
    %31 = arith.select %27, %29, %30 : vector<8x16xi1>, vector<8x16xf32>
    %cst_18 = arith.constant dense<0.000000e+00> : vector<8x128xf32>
    %32 = tpu.matmul %31, %12, %cst_18 {dimension_numbers = #tpu.dot_dimension_numbers<[1], [0], [0], [1], [0, 0, 1, 1], [], []>} : vector<8x16xf32>, vector<16x128xf32>, vector<8x128xf32> -> vector<8x128xf32>
    %33 = vector.extract_strided_slice %4 {offsets = [8, 0], sizes = [8, 128], strides = [1, 1]} : vector<16x128xf32> to vector<8x128xf32>
    %34 = vector.extract_strided_slice %8 {offsets = [16, 0], sizes = [16, 128], strides = [1, 1]} : vector<32x128xf32> to vector<16x128xf32>
    %35 = vector.extract_strided_slice %9 {offsets = [16, 0], sizes = [16, 128], strides = [1, 1]} : vector<32x128xf32> to vector<16x128xf32>
    %cst_19 = arith.constant dense<0.000000e+00> : vector<8x16xf32>
    %36 = tpu.matmul %33, %34, %cst_19 {dimension_numbers = #tpu.dot_dimension_numbers<[1], [1], [0], [0], [0, 0, 1, 0], [], []>} : vector<8x128xf32>, vector<16x128xf32>, vector<8x16xf32> -> vector<8x16xf32>
    %cst_20 = arith.constant dense<0xFF800000> : vector<8xf32>
    %37 = vector.multi_reduction <maximumf>, %36, %cst_20 [1] : vector<8x16xf32> to vector<8xf32>
    %38 = vector.shape_cast %37 : vector<8xf32> to vector<8x1xf32>
    %39 = vector.broadcast %38 : vector<8x1xf32> to vector<8x16xf32>
    %40 = arith.subf %36, %39 : vector<8x16xf32>
    %41 = math.exp %40 : vector<8x16xf32>
    %cst_21 = arith.constant dense<0.000000e+00> : vector<8xf32>
    %42 = vector.multi_reduction <add>, %41, %cst_21 [1] : vector<8x16xf32> to vector<8xf32>
    %43 = vector.shape_cast %42 : vector<8xf32> to vector<8x1xf32>
    %cst_22 = arith.constant 1.000000e+00 : f32
    %44 = vector.broadcast %cst_22 : f32 to vector<8x1xf32>
    %45 = arith.divf %44, %43 : vector<8x1xf32>
    %46 = vector.broadcast %45 : vector<8x1xf32> to vector<8x16xf32>
    %47 = arith.mulf %41, %46 : vector<8x16xf32>
    %c8 = arith.constant 8 : index
    %c0_23 = arith.constant 0 : index
    %48 = vector.load %arg3[%c8, %c0_23] : memref<16x16xf32, #tpu.memory_space<vmem>>, vector<8x16xf32>
    %cst_24 = arith.constant 1.000000e-01 : f32
    %49 = vector.broadcast %cst_24 : f32 to vector<8x16xf32>
    %50 = arith.cmpf oge, %48, %49 : vector<8x16xf32>
    %cst_25 = arith.constant 1.11111116 : f32
    %51 = vector.broadcast %cst_25 : f32 to vector<8x16xf32>
    %52 = arith.mulf %47, %51 : vector<8x16xf32>
    %cst_26 = arith.constant 0.000000e+00 : f32
    %53 = vector.broadcast %cst_26 : f32 to vector<8x16xf32>
    %54 = arith.select %50, %52, %53 : vector<8x16xi1>, vector<8x16xf32>
    %cst_27 = arith.constant dense<0.000000e+00> : vector<8x128xf32>
    %55 = tpu.matmul %54, %35, %cst_27 {dimension_numbers = #tpu.dot_dimension_numbers<[1], [0], [0], [1], [0, 0, 1, 1], [], []>} : vector<8x16xf32>, vector<16x128xf32>, vector<8x128xf32> -> vector<8x128xf32>
    %56 = tpu.concatenate %32, %55 in 0 : vector<8x128xf32>, vector<8x128xf32> -> vector<16x128xf32>
    %c0_28 = arith.constant 0 : index
    %c0_29 = arith.constant 0 : index
    %57 = vector.load %arg6[%c0_28, %c0_29] : memref<16x128xf32, #tpu.memory_space<vmem>>, vector<16x128xf32>
    tpu.vector_store %arg6[%c0_28, %c0_29], %56 {strides = array<i32>} : memref<16x128xf32, #tpu.memory_space<vmem>>, vector<16x128xf32>,
    return
  }
  func.func @transform_0(%arg0: i32) -> (i32, i32) {
    %c0_i32 = arith.constant 0 : i32
    %c0_i32_0 = arith.constant 0 : i32
    return %arg0, %c0_i32 : i32, i32
  }
  func.func @transform_1(%arg0: i32) -> (i32, i32) {
    %c0_i32 = arith.constant 0 : i32
    %c0_i32_0 = arith.constant 0 : i32
    return %arg0, %c0_i32 : i32, i32
  }
  func.func @transform_2(%arg0: i32) -> (i32, i32) {
    %c0_i32 = arith.constant 0 : i32
    %c0_i32_0 = arith.constant 0 : i32
    return %arg0, %c0_i32 : i32, i32
  }
  func.func @transform_3(%arg0: i32) -> (i32, i32) {
    %c0_i32 = arith.constant 0 : i32
    %c0_i32_0 = arith.constant 0 : i32
    %c0_i32_1 = arith.constant 0 : i32
    return %c0_i32, %c0_i32_0 : i32, i32
  }
  func.func @transform_4(%arg0: i32) -> (i32, i32) {
    %c0_i32 = arith.constant 0 : i32
    %c0_i32_0 = arith.constant 0 : i32
    %c0_i32_1 = arith.constant 0 : i32
    return %c0_i32, %c0_i32_0 : i32, i32
  }
  func.func @transform_5(%arg0: i32) -> (i32, i32) {
    %c0_i32 = arith.constant 0 : i32
    %c0_i32_0 = arith.constant 0 : i32
    return %arg0, %c0_i32 : i32, i32
  }
}

</mosaic_0001>

<bundles_post_ra>
// kernel: tpu_custom_call.1
= control target key start
LH: loop header
LB: loop body
LE: loop exit
PB: predicated region body
PF: predicated region fallthrough
CT: control target
= control target key end

     0   :  { %10 = vsyncpa [#allocation3], 0  ;;  %s1199_s0 = inlined_call_operand.hbm [shape: f32[16,256], index: 0, kind: input, shape index: {}]   ;;  %s1200_s1 = inlined_call_operand.hbm [shape: f32[32,256], index: 1, kind: input, shape index: {}]   ;;  %s1201_s2 = inlined_call_operand.hbm [shape: f32[16,16], index: 2, kind: input, shape index: {}]   ;;  %s1202_s3 = inlined_call_operand.hbm [shape: f32[256,128], index: 3, kind: input, shape index: {}]   ;;  %s1203_s4 = inlined_call_operand.hbm [shape: f32[256,256], index: 4, kind: input, shape index: {}]   ;;  %s1204_s5 = inlined_call_operand.hbm [shape: f32[16,128], index: 5, kind: output, shape index: {}]  }
   0x1   :  { %11 = vsyncpa [#allocation6], 0 }
   0x2   :  { %12 = vsyncpa [#allocation9], 0 }
   0x3   :  { %13 = vsyncpa [#allocation4], 0  ;;  %s1052_s18 = smov [#allocation5]   ;;  %s912_s22 = scalar_lea.hbm %s1200_s1, 1024 }
   0x4   :  { %s31_s19 = sshll.u32 %s1052_s18, 4  ;;  %p913_p0 = scmp.ne.s32.totalorder %s1200_s1, %s912_s22  ;;  %s32_s19 = int_to_ptr.vmem [resolvable:$true] %s31_s19 }
   0x5   :  { %p916_p1 = scmp.lt.u32.totalorder %s912_s22, %s1200_s1 }
   0x7   :  { %p918_p2 = pnand %p916_p1, %p913_p0 }
   0x9   :  { %921 = shalt.err (!%p918_p2)
}
   0xa   :  { %s922_s27 = scalar_lea.vmem %s32_s19, 1024  ;;  %p927_p4 = scmp.lt.s32.totalorder %s32_s19, %s32_s19 }
   0xb   :  { %p923_p3 = scmp.ne.s32.totalorder %s32_s19, %s922_s27  ;;  %p928_p5 = scmp.lt.s32.totalorder %s922_s27, %s922_s27 }
   0xd   :  { %p929_p6 = por %p928_p5, %p927_p4 }
   0xf   :  { %p930_p7 = pnand %p929_p6, %p923_p3 }
  0x11   :  { %933 = shalt.err (!%p930_p7)
}
  0x12   :  { %s1053_s28 = smov 256   ;;  %s1054_s29 = smov 16  }
  0x13   :  { %37 = dma.hbm_to_vmem [thread:$0]  %s1200_s1, 1024, %s32_s19, [#allocation6], %s1053_s28, %s1053_s28, %s1054_s29  }
  0x14   :  { %s1055_s7 = smov [#allocation8]   ;;  %s1056_s9 = smov [#allocation2]  }
  0x15   :  { %s55_s8 = sshll.u32 %s1055_s7, 4  ;;  %s19_s10 = sshll.u32 %s1056_s9, 4  ;;  %s56_s8 = int_to_ptr.vmem [resolvable:$true] %s55_s8  ;;  %s20_s10 = int_to_ptr.vmem [resolvable:$true] %s19_s10 }
  0x16   :  { %s934_s13 = scalar_lea.hbm %s1202_s3, 4096 }
  0x17   :  { %p935_p8 = scmp.ne.s32.totalorder %s1202_s3, %s934_s13  ;;  %p938_p9 = scmp.lt.u32.totalorder %s934_s13, %s1202_s3 }
  0x19   :  { %p940_p10 = pnand %p938_p9, %p935_p8 }
  0x1b   :  { %943 = shalt.err (!%p940_p10)
}
  0x1c   :  { %s944_s1 = scalar_lea.vmem %s56_s8, 4096  ;;  %p949_p12 = scmp.lt.s32.totalorder %s56_s8, %s56_s8 }
  0x1d   :  { %p945_p11 = scmp.ne.s32.totalorder %s56_s8, %s944_s1  ;;  %p950_p13 = scmp.lt.s32.totalorder %s944_s1, %s944_s1 }
  0x1f   :  { %p951_p0 = por %p950_p13, %p949_p12 }
  0x21   :  { %p952_p1 = pnand %p951_p0, %p945_p11 }
  0x23   :  { %955 = shalt.err (!%p952_p1)
}
  0x24   :  { %s1057_s18 = smov 128   ;;  %s1058_s19 = smov 8  }
  0x25   :  { %61 = dma.hbm_to_vmem [thread:$0]  %s1202_s3, 4096, %s56_s8, [#allocation9], %s1057_s18, %s1057_s18, %s1058_s19  }
  0x26   :  { %s956_s24 = scalar_lea.hbm %s1199_s0, 512 }
  0x27   :  { %p957_p2 = scmp.ne.s32.totalorder %s1199_s0, %s956_s24  ;;  %p960_p3 = scmp.lt.u32.totalorder %s956_s24, %s1199_s0 }
  0x29   :  { %p962_p4 = pnand %p960_p3, %p957_p2 }
  0x2b   :  { %965 = shalt.err (!%p962_p4)
}
  0x2c   :  { %s966_s6 = scalar_lea.vmem %s20_s10, 512  ;;  %p971_p6 = scmp.lt.s32.totalorder %s20_s10, %s20_s10 }
  0x2d   :  { %p967_p5 = scmp.ne.s32.totalorder %s20_s10, %s966_s6  ;;  %p972_p7 = scmp.lt.s32.totalorder %s966_s6, %s966_s6 }
  0x2f   :  { %p973_p8 = por %p972_p7, %p971_p6 }
  0x31   :  { %p974_p9 = pnand %p973_p8, %p967_p5 }
  0x33   :  { %977 = shalt.err (!%p974_p9)
}
  0x34   :  { %25 = dma.hbm_to_vmem [thread:$0]  %s1199_s0, 512, %s20_s10, [#allocation3], %s1053_s28, %s1053_s28, %s1054_s29  }
  0x35   :  { %s1059_s8 = smov [#allocation7]   ;;  %s1060_s11 = smov [#allocation10]  }
  0x36   :  { %s43_s9 = sshll.u32 %s1059_s8, 4  ;;  %s67_s12 = sshll.u32 %s1060_s11, 4  ;;  %s44_s9 = int_to_ptr.vmem [resolvable:$true] %s43_s9  ;;  %s68_s12 = int_to_ptr.vmem [resolvable:$true] %s67_s12 }
  0x37   :  { %s978_s15 = scalar_lea.hbm %s1201_s2, 256 }
  0x38   :  { %p979_p10 = scmp.ne.s32.totalorder %s1201_s2, %s978_s15  ;;  %p982_p11 = scmp.lt.u32.totalorder %s978_s15, %s1201_s2 }
  0x3a   :  { %p984_p12 = pnand %p982_p11, %p979_p10 }
  0x3c   :  { %987 = shalt.err (!%p984_p12)
}
  0x3d   :  { %s988_s0 = scalar_lea.vmem %s44_s9, 256  ;;  %p993_p0 = scmp.lt.s32.totalorder %s44_s9, %s44_s9 }
  0x3e   :  { %p989_p13 = scmp.ne.s32.totalorder %s44_s9, %s988_s0  ;;  %p994_p1 = scmp.lt.s32.totalorder %s988_s0, %s988_s0 }
  0x40   :  { %p995_p2 = por %p994_p1, %p993_p0 }
  0x42   :  { %p996_p3 = pnand %p995_p2, %p989_p13 }
  0x44   :  { %999 = shalt.err (!%p996_p3)
}
  0x45   :  { %49 = dma.hbm_to_vmem [thread:$0]  %s1201_s2, 256, %s44_s9, [#allocation6], %s1057_s18, %s1057_s18, %s1058_s19  }
  0x46   :  { %s1000_s24 = scalar_lea.hbm %s1203_s4, 8192 }
  0x47   :  { %p1001_p4 = scmp.ne.s32.totalorder %s1203_s4, %s1000_s24  ;;  %p1004_p5 = scmp.lt.u32.totalorder %s1000_s24, %s1203_s4 }
  0x49   :  { %p1006_p6 = pnand %p1004_p5, %p1001_p4 }
  0x4b   :  { %1009 = shalt.err (!%p1006_p6)
}
  0x4c   :  { %s1010_s6 = scalar_lea.vmem %s68_s12, 8192  ;;  %p1015_p8 = scmp.lt.s32.totalorder %s68_s12, %s68_s12 }
  0x4d   :  { %p1011_p7 = scmp.ne.s32.totalorder %s68_s12, %s1010_s6  ;;  %p1016_p9 = scmp.lt.s32.totalorder %s1010_s6, %s1010_s6 }
  0x4f   :  { %p1017_p10 = por %p1016_p9, %p1015_p8 }
  0x51   :  { %p1018_p11 = pnand %p1017_p10, %p1011_p7 }
  0x53   :  { %1021 = shalt.err (!%p1018_p11)
}
  0x54   :  { %73 = dma.hbm_to_vmem [thread:$0]  %s1203_s4, 8192, %s68_s12, [#allocation9], %s1053_s28, %s1053_s28, %s1054_s29  }
  0x55   :  { %1044 = dma.done.wait [#allocation3], 512  }
  0x56   :  { %1045 = vsyncadd [#allocation3], 4294966784 }
  0x57   :  { %1046 = dma.done.wait [#allocation6], 1280  }
  0x58   :  { %1047 = vsyncadd [#allocation6], 4294966016 }
  0x59   :  { %1048 = dma.done.wait [#allocation9], 12288  }
  0x5a   :  { %1049 = vsyncadd [#allocation9], 4294955008  ;;  %v211_v0 = vld [vmem:[#allocation10 + $0x8] sm:$0xff]  ;;  %v213_v1 = vld [vmem:[#allocation10 + $0x18] sm:$0xff]  ;;  %vm1062_vm0 = vmmov 0   ;;  %vm433_vm1 = vcmask 130048  }
  0x5b   :  { %v210_v2 = vld [vmem:[#allocation10] sm:$0xff]  ;;  %v815_v3 = vpack.c.bf16 %v213_v1, %v211_v0  ;;  %v212_v4 = vld [vmem:[#allocation10 + $0x10] sm:$0xff]  ;;  %v215_v5 = vld [vmem:[#allocation10 + $0x28] sm:$0xff]  ;;  %s1064_s4 = smov [#allocation11]  }
  0x5c   :  { %v217_v6 = vld [vmem:[#allocation10 + $0x38] sm:$0xff]  ;;  %v817_v7 = vpack.c.bf16 %v212_v4, %v210_v2  ;;  %v214_v9 = vld [vmem:[#allocation10 + $0x20] sm:$0xff]  ;;  %v216_v10 = vld [vmem:[#allocation10 + $0x30] sm:$0xff]  ;;  %s689_s28 = sshll.u32 %s1064_s4, 4  ;;  %s690_s28 = int_to_ptr.vmem [resolvable:$true] %s689_s28 }
  0x5d   :  { %v819_v8 = vpack.c.bf16 %v217_v6, %v215_v5  ;;  %v219_v11 = vld [vmem:[#allocation10 + $0x48] sm:$0xff]  ;;  %816 = vmatprep.subr.bf16.mxu1 %v815_v3  ;;  %v221_v12 = vld [vmem:[#allocation10 + $0x58] sm:$0xff]  ;;  %v821_v13 = vpack.c.bf16 %v216_v10, %v214_v9  ;;  %v218_v15 = vld [vmem:[#allocation10 + $0x40] sm:$0xff]  ;;  %s1022_s29 = scalar_lea.vmem %s690_s28, 256  ;;  %p1027_p13 = scmp.lt.s32.totalorder %s690_s28, %s690_s28 }
  0x5e   :  { %818 = vmatpush1.bf16.msra.mxu1 %v817_v7  ;;  %v823_v14 = vpack.c.bf16 %v221_v12, %v219_v11  ;;  %v220_v16 = vld [vmem:[#allocation10 + $0x50] sm:$0xff]  ;;  %v223_v17 = vld [vmem:[#allocation10 + $0x68] sm:$0xff]  ;;  %v225_v18 = vld [vmem:[#allocation10 + $0x78] sm:$0xff]  ;;  %p1023_p12 = scmp.ne.s32.totalorder %s690_s28, %s1022_s29  ;;  %p1028_p0 = scmp.lt.s32.totalorder %s1022_s29, %s1022_s29 }
  0x5f   :  { %820 = vmatprep.subr.bf16.mxu1 %v819_v8  ;;  %v825_v19 = vpack.c.bf16 %v220_v16, %v218_v15  ;;  %v827_v20 = vpack.c.bf16 %v225_v18, %v223_v17  ;;  %v222_v21 = vld [vmem:[#allocation10 + $0x60] sm:$0xff]  ;;  %v224_v22 = vld [vmem:[#allocation10 + $0x70] sm:$0xff]  ;;  %v227_v23 = vld [vmem:[#allocation10 + $0x88] sm:$0xff] }
  0x60   :  { %v229_v24 = vld [vmem:[#allocation10 + $0x98] sm:$0xff]  ;;  %v829_v25 = vpack.c.bf16 %v224_v22, %v222_v21  ;;  %v226_v26 = vld [vmem:[#allocation10 + $0x80] sm:$0xff]  ;;  %v228_v28 = vld [vmem:[#allocation10 + $0x90] sm:$0xff]  ;;  %p1029_p1 = por %p1028_p0, %p1027_p13 }
  0x61   :  { %v831_v27 = vpack.c.bf16 %v229_v24, %v227_v23  ;;  %v109_v29 = vld [vmem:[#allocation8 + $0x80] sm:$0xff]  ;;  %v110_v30 = vld [vmem:[#allocation8 + $0x88] sm:$0xff]  ;;  %v233_v32 = vld [vmem:[#allocation10 + $0xb8] sm:$0xff]  ;;  %v833_v36 = vpack.c.bf16 %v228_v28, %v226_v26 }
  0x62   :  { %822 = vmatpush1.bf16.msra.mxu1 %v821_v13  ;;  %v231_v31 = vld [vmem:[#allocation10 + $0xa8] sm:$0xff]  ;;  %v783_v33 = vpack.c.bf16 %v110_v30, %v109_v29  ;;  %v93_v34 = vld [vmem:[#allocation8] sm:$0xff]  ;;  %v111_v39 = vld [vmem:[#allocation8 + $0x90] sm:$0xff]  ;;  %p1030_p2 = pnand %p1029_p1, %p1023_p12 }
  0x63   :  { %824 = vmatprep.subr.bf16.mxu1 %v823_v14  ;;  %v94_v35 = vld [vmem:[#allocation8 + $0x8] sm:$0xff]  ;;  %v230_v37 = vld [vmem:[#allocation10 + $0xa0] sm:$0xff]  ;;  %v112_v40 = vld [vmem:[#allocation8 + $0x98] sm:$0xff]  ;;  %v835_v41 = vpack.c.bf16 %v233_v32, %v231_v31 }
  0x64   :  { %784 = vmatprep.subr.bf16.mxu0 %v783_v33  ;;  %v785_v38 = vpack.c.bf16 %v94_v35, %v93_v34  ;;  %v232_v42 = vld [vmem:[#allocation10 + $0xb0] sm:$0xff]  ;;  %v787_v43 = vpack.c.bf16 %v112_v40, %v111_v39  ;;  %v96_v45 = vld [vmem:[#allocation8 + $0x18] sm:$0xff]  ;;  %v235_v46 = vld [vmem:[#allocation10 + $0xc8] sm:$0xff] }
  0x65   :  { %v95_v44 = vld [vmem:[#allocation8 + $0x10] sm:$0xff]  ;;  %v237_v47 = vld [vmem:[#allocation10 + $0xd8] sm:$0xff]  ;;  %v113_v49 = vld [vmem:[#allocation8 + $0xa0] sm:$0xff]  ;;  %v837_v51 = vpack.c.bf16 %v232_v42, %v230_v37 }
  0x66   :  { %826 = vmatpush1.bf16.msra.mxu1 %v825_v19  ;;  %786 = vmatpush3.bf16.msra.mxu0 %v785_v38  ;;  %v789_v48 = vpack.c.bf16 %v96_v45, %v95_v44  ;;  %v114_v50 = vld [vmem:[#allocation8 + $0xa8] sm:$0xff]  ;;  %v234_v52 = vld [vmem:[#allocation10 + $0xc0] sm:$0xff]  ;;  %v839_v56 = vpack.c.bf16 %v237_v47, %v235_v46  ;;  %v236_v57 = vld [vmem:[#allocation10 + $0xd0] sm:$0xff] }
  0x67   :  { %828 = vmatprep.subr.bf16.mxu1 %v827_v20  ;;  %788 = vmatprep.subr.bf16.mxu0 %v787_v43  ;;  %v791_v53 = vpack.c.bf16 %v114_v50, %v113_v49  ;;  %v97_v54 = vld [vmem:[#allocation8 + $0x20] sm:$0xff]  ;;  %v98_v55 = vld [vmem:[#allocation8 + $0x28] sm:$0xff]  ;;  %v115_v58 = vld [vmem:[#allocation8 + $0xb0] sm:$0xff]  ;;  %v841_v2 = vpack.c.bf16 %v236_v57, %v234_v52 }
  0x68   :  { %v116_v59 = vld [vmem:[#allocation8 + $0xb8] sm:$0xff]  ;;  %v239_v60 = vld [vmem:[#allocation10 + $0xe8] sm:$0xff]  ;;  %v793_v62 = vpack.c.bf16 %v98_v55, %v97_v54  ;;  %v99_v0 = vld [vmem:[#allocation8 + $0x30] sm:$0xff] }
  0x69   :  { %v241_v61 = vld [vmem:[#allocation10 + $0xf8] sm:$0xff]  ;;  %v795_v63 = vpack.c.bf16 %v116_v59, %v115_v58  ;;  %v117_v3 = vld [vmem:[#allocation8 + $0xc0] sm:$0xff]  ;;  %v118_v4 = vld [vmem:[#allocation8 + $0xc8] sm:$0xff] }
  0x6a   :  { %830 = vmatpush1.bf16.msra.mxu1 %v829_v25  ;;  %790 = vmatpush3.bf16.msra.mxu0 %v789_v48  ;;  %v100_v1 = vld [vmem:[#allocation8 + $0x38] sm:$0xff]  ;;  %v843_v5 = vpack.c.bf16 %v241_v61, %v239_v60  ;;  %v238_v6 = vld [vmem:[#allocation10 + $0xe0] sm:$0xff]  ;;  %v240_v7 = vld [vmem:[#allocation10 + $0xf0] sm:$0xff]  ;;  %v799_v11 = vpack.c.bf16 %v118_v4, %v117_v3 }
  0x6b   :  { %832 = vmatprep.subr.bf16.mxu1 %v831_v27  ;;  %792 = vmatprep.subr.bf16.mxu0 %v791_v53  ;;  %v243_v8 = vld [vmem:[#allocation10 + $0x108] sm:$0xff]  ;;  %v245_v9 = vld [vmem:[#allocation10 + $0x118] sm:$0xff]  ;;  %v797_v10 = vpack.c.bf16 %v100_v1, %v99_v0  ;;  %v101_v12 = vld [vmem:[#allocation8 + $0x40] sm:$0xff]  ;;  %v845_v14 = vpack.c.bf16 %v240_v7, %v238_v6 }
  0x6c   :  { %v102_v13 = vld [vmem:[#allocation8 + $0x48] sm:$0xff]  ;;  %v119_v15 = vld [vmem:[#allocation8 + $0xd0] sm:$0xff]  ;;  %v120_v16 = vld [vmem:[#allocation8 + $0xd8] sm:$0xff]  ;;  %v847_v17 = vpack.c.bf16 %v245_v9, %v243_v8 }
  0x6d   :  { %v242_v18 = vld [vmem:[#allocation10 + $0x100] sm:$0xff]  ;;  %v244_v19 = vld [vmem:[#allocation10 + $0x110] sm:$0xff]  ;;  %v203_v20 = vld [vmem:[#allocation5 + $0x8] sm:$0xff]  ;;  %v801_v23 = vpack.c.bf16 %v102_v13, %v101_v12  ;;  %v803_v24 = vpack.c.bf16 %v120_v16, %v119_v15 }
  0x6e   :  { %834 = vmatpush1.bf16.msra.mxu1 %v833_v36  ;;  %794 = vmatpush3.bf16.msra.mxu0 %v793_v62  ;;  %v247_v21 = vld [vmem:[#allocation10 + $0x128] sm:$0xff]  ;;  %v249_v22 = vld [vmem:[#allocation10 + $0x138] sm:$0xff]  ;;  %v103_v25 = vld [vmem:[#allocation8 + $0x50] sm:$0xff]  ;;  %v849_v27 = vpack.c.bf16 %v244_v19, %v242_v18 }
  0x6f   :  { %836 = vmatprep.subr.bf16.mxu1 %v835_v41  ;;  %796 = vmatprep.subr.bf16.mxu0 %v795_v63  ;;  %v104_v26 = vld [vmem:[#allocation8 + $0x58] sm:$0xff]  ;;  %v121_v28 = vld [vmem:[#allocation8 + $0xe0] sm:$0xff]  ;;  %v122_v29 = vld [vmem:[#allocation8 + $0xe8] sm:$0xff]  ;;  %v851_v30 = vpack.c.bf16 %v249_v22, %v247_v21  ;;  %v1061_v22 = vmov 0.0|0.0  }
  0x70   :  { %338 = vmatprep.mubr.f32.mxu1 %v203_v20  ;;  %v246_v31 = vld [vmem:[#allocation10 + $0x120] sm:$0xff]  ;;  %v248_v32 = vld [vmem:[#allocation10 + $0x130] sm:$0xff]  ;;  %v90_v33 = vld [vmem:[#allocation2 + $0x8] sm:$0xff]  ;;  %v805_v36 = vpack.c.bf16 %v104_v26, %v103_v25  ;;  %v807_v37 = vpack.c.bf16 %v122_v29, %v121_v28  ;;  %v1063_v25 = vmov 0.0  }
  0x71   :  { %v251_v34 = vld [vmem:[#allocation10 + $0x148] sm:$0xff]  ;;  %v253_v35 = vld [vmem:[#allocation10 + $0x158] sm:$0xff]  ;;  %189 = vmatprep.mubr.f32.mxu0 %v90_v33  ;;  %v105_v38 = vld [vmem:[#allocation8 + $0x60] sm:$0xff]  ;;  %v853_v40 = vpack.c.bf16 %v248_v32, %v246_v31 }
  0x72   :  { %838 = vmatpush1.bf16.msra.mxu1 %v837_v51  ;;  %798 = vmatpush3.bf16.msra.mxu0 %v797_v10  ;;  %v106_v39 = vld [vmem:[#allocation8 + $0x68] sm:$0xff]  ;;  %v123_v41 = vld [vmem:[#allocation8 + $0xf0] sm:$0xff]  ;;  %v124_v42 = vld [vmem:[#allocation8 + $0xf8] sm:$0xff]  ;;  %v855_v43 = vpack.c.bf16 %v253_v35, %v251_v34 }
  0x73   :  { %840 = vmatprep.subr.bf16.mxu1 %v839_v56  ;;  %800 = vmatprep.subr.bf16.mxu0 %v799_v11  ;;  %v250_v44 = vld [vmem:[#allocation10 + $0x140] sm:$0xff]  ;;  %v252_v45 = vld [vmem:[#allocation10 + $0x150] sm:$0xff]  ;;  %v255_v46 = vld [vmem:[#allocation10 + $0x168] sm:$0xff]  ;;  %v809_v48 = vpack.c.bf16 %v106_v39, %v105_v38  ;;  %v811_v49 = vpack.c.bf16 %v124_v42, %v123_v41 }
  0x74   :  { %v257_v47 = vld [vmem:[#allocation10 + $0x178] sm:$0xff]  ;;  %v107_v50 = vld [vmem:[#allocation8 + $0x70] sm:$0xff]  ;;  %v857_v52 = vpack.c.bf16 %v252_v45, %v250_v44  ;;  %v254_v54 = vld [vmem:[#allocation10 + $0x160] sm:$0xff] }
  0x75   :  { %v108_v51 = vld [vmem:[#allocation8 + $0x78] sm:$0xff]  ;;  %v859_v53 = vpack.c.bf16 %v257_v47, %v255_v46  ;;  %v256_v55 = vld [vmem:[#allocation10 + $0x170] sm:$0xff]  ;;  %v259_v56 = vld [vmem:[#allocation10 + $0x188] sm:$0xff] }
  0x76   :  { %842 = vmatpush1.bf16.msra.mxu1 %v841_v2  ;;  %802 = vmatpush3.bf16.msra.mxu0 %v801_v23  ;;  %v261_v57 = vld [vmem:[#allocation10 + $0x198] sm:$0xff]  ;;  %v813_v58 = vpack.c.bf16 %v108_v51, %v107_v50  ;;  %v861_v59 = vpack.c.bf16 %v256_v55, %v254_v54  ;;  %v258_v61 = vld [vmem:[#allocation10 + $0x180] sm:$0xff]  ;;  %v260_v62 = vld [vmem:[#allocation10 + $0x190] sm:$0xff] }
  0x77   :  { %844 = vmatprep.subr.bf16.mxu1 %v843_v5  ;;  %804 = vmatprep.subr.bf16.mxu0 %v803_v24  ;;  %v863_v60 = vpack.c.bf16 %v261_v57, %v259_v56  ;;  %v263_v63 = vld [vmem:[#allocation10 + $0x1a8] sm:$0xff]  ;;  %v265_v0 = vld [vmem:[#allocation10 + $0x1b8] sm:$0xff]  ;;  %v89_v1 = vld [vmem:[#allocation2] sm:$0xff]  ;;  %v865_v2 = vpack.c.bf16 %v260_v62, %v258_v61 }
  0x78   :  { %v867_v3 = vpack.c.bf16 %v265_v0, %v263_v63  ;;  %v262_v4 = vld [vmem:[#allocation10 + $0x1a0] sm:$0xff]  ;;  %v264_v5 = vld [vmem:[#allocation10 + $0x1b0] sm:$0xff]  ;;  %v267_v6 = vld [vmem:[#allocation10 + $0x1c8] sm:$0xff] }
  0x79   :  { %v269_v7 = vld [vmem:[#allocation10 + $0x1d8] sm:$0xff]  ;;  %v869_v8 = vpack.c.bf16 %v264_v5, %v262_v4  ;;  %v266_v10 = vld [vmem:[#allocation10 + $0x1c0] sm:$0xff]  ;;  %v268_v11 = vld [vmem:[#allocation10 + $0x1d0] sm:$0xff] }
  0x7a   :  { %846 = vmatpush1.bf16.msra.mxu1 %v845_v14  ;;  %806 = vmatpush3.bf16.msra.mxu0 %v805_v36  ;;  %v871_v9 = vpack.c.bf16 %v269_v7, %v267_v6  ;;  %v271_v12 = vld [vmem:[#allocation10 + $0x1e8] sm:$0xff]  ;;  %v273_v13 = vld [vmem:[#allocation10 + $0x1f8] sm:$0xff]  ;;  %v873_v14 = vpack.c.bf16 %v268_v11, %v266_v10  ;;  %v270_v16 = vld [vmem:[#allocation10 + $0x1e0] sm:$0xff] }
  0x7b   :  { %848 = vmatprep.subr.bf16.mxu1 %v847_v17  ;;  %808 = vmatprep.subr.bf16.mxu0 %v807_v37  ;;  %v875_v15 = vpack.c.bf16 %v273_v13, %v271_v12  ;;  %v272_v17 = vld [vmem:[#allocation10 + $0x1f0] sm:$0xff]  ;;  %v205_v20 = vld [vmem:[#allocation5 + $0x18] sm:$0xff]  ;;  %v204_v21 = vld [vmem:[#allocation5 + $0x10] sm:$0xff] }
  0x7c   :  { %v877_v18 = vpack.c.bf16 %v272_v17, %v270_v16  ;;  %v202_v19 = vld [vmem:[#allocation5] sm:$0xff]  ;;  %v92_v23 = vld [vmem:[#allocation2 + $0x18] sm:$0xff]  ;;  %v91_v24 = vld [vmem:[#allocation2 + $0x10] sm:$0xff] }
  0x7d   :  { %v207_v39 = vld [vmem:[#allocation5 + $0x28] sm:$0xff]  ;;  %v209_v41 = vld [vmem:[#allocation5 + $0x38] sm:$0xff]  ;;  %v208_v42 = vld [vmem:[#allocation5 + $0x30] sm:$0xff] }
  0x7e   :  { %850 = vmatpush1.bf16.msra.mxu1 %v849_v27  ;;  %810 = vmatpush3.bf16.msra.mxu0 %v809_v48  ;;  %v605_v11 = vld [vmem:[#allocation7 + $0x8] sm:$0xff] }
  0x7f   :  { %852 = vmatprep.subr.bf16.mxu1 %v851_v30  ;;  %812 = vmatprep.subr.bf16.mxu0 %v811_v49  ;;  %vm606_vm3 = vcmp.ge.f32.partialorder %v605_v11, 0.1 }
  0x82   :  { %854 = vmatpush1.bf16.msra.mxu1 %v853_v40  ;;  %814 = vmatpush3.bf16.msra.mxu0 %v813_v58  ;;  %v206_v40 = vld [vmem:[#allocation5 + $0x20] sm:$0xff] }
  0x83   :  { %856 = vmatprep.subr.bf16.mxu1 %v855_v43  ;;  %879 = vmatprep.subr.bf16.mxu0 %v1061_v22  ;;  %v446_v58 = vld [vmem:[#allocation7] sm:$0xff] }
  0x84   :  { %vm447_vm2 = vcmp.ge.f32.partialorder %v446_v58, 0.1 }
  0x85   :  { %190 = vmatmul.mubr.f32.vlgmr.msra.gmra.mrb[0].mxu0 %v89_v1 }
  0x86   :  { %858 = vmatpush1.bf16.msra.mxu1 %v857_v52  ;;  %194 = vmatprep.mubr.f32.mxu0 %v92_v23 }
  0x87   :  { %860 = vmatprep.subr.bf16.mxu1 %v859_v53 }
  0x89   :  { %195 = vmatmul.mubr.f32.gmra.mrb[2].mxu0 %v91_v24 }
  0x8a   :  { %862 = vmatpush1.bf16.msra.mxu1 %v861_v59  ;;  %759 = vmatprep.mubr.msk.f32.mxu0 %vm1062_vm0, %v1063_v25 }
  0x8b   :  { %864 = vmatprep.subr.bf16.mxu1 %v863_v60 }
  0x8e   :  { %866 = vmatpush1.bf16.msra.mxu1 %v865_v2 }
  0x8f   :  { %868 = vmatprep.subr.bf16.mxu1 %v867_v3 }
  0x92   :  { %870 = vmatpush1.bf16.msra.mxu1 %v869_v8 }
  0x93   :  { %872 = vmatprep.subr.bf16.mxu1 %v871_v9 }
  0x96   :  { %874 = vmatpush1.bf16.msra.mxu1 %v873_v14 }
  0x97   :  { %876 = vmatprep.subr.bf16.mxu1 %v875_v15 }
  0x9a   :  { %878 = vmatpush1.bf16.msra.mxu1 %v877_v18 }
  0x9d   :  { %339 = vmatmul.mubr.f32.vlgmr.msra.gmra.mrb[0].mxu1 %v202_v19 }
  0x9e   :  { %344 = vmatprep.mubr.f32.mxu1 %v205_v20 }
  0xa1   :  { %345 = vmatmul.mubr.f32.gmra.mrb[2].mxu1 %v204_v21 }
  0xa2   :  { %350 = vmatprep.mubr.f32.mxu1 %v207_v39 }
  0xa5   :  { %351 = vmatmul.mubr.f32.gmra.mrb[4].mxu1 %v206_v40 }
  0xa6   :  { %356 = vmatprep.mubr.f32.mxu1 %v209_v41 }
  0xa9   :  { %357 = vmatmul.mubr.f32.gmra.mrb[6].mxu1 %v208_v42 }
 0x158   :  { %v737_v26 = vpop.f32.mrb[0].mxu0 }
 0x159   :  { %v738_v27 = vpop.f32.mrb[1].mxu0 }
 0x15a   :  { %v739_v28 = vadd.f32 %v738_v27, %v737_v26 }
 0x15c   :  { %v200_v35 = vmul.f32 0.0625, %v739_v28  ;;  %v740_v36 = vpop.f32.mrb[2].mxu0 }
 0x15d   :  { %v741_v37 = vpop.f32.mrb[3].mxu0 }
 0x15e   :  { %v742_v38 = vadd.f32 %v741_v37, %v740_v36 }
 0x160   :  { %v201_v63 = vmul.f32 0.0625, %v742_v38 }
 0x170   :  { %v340_v29 = vpop.f32.mrb[0].mxu1 }
 0x171   :  { %v342_v30 = vpop.f32.mrb[1].mxu1 }
 0x174   :  { %v346_v31 = vpop.f32.mrb[2].mxu1 }
 0x175   :  { %v880_v32 = vpack.c.bf16 %v346_v31, %v340_v29  ;;  %v348_v33 = vpop.f32.mrb[3].mxu1 }
 0x176   :  { %v883_v34 = vpack.c.bf16 %v348_v33, %v342_v30 }
 0x177   :  { %881 = vmatpush3.bf16.xpose.msra.mxu0 %v880_v32 }
 0x178   :  { %882 = vmatprep.subr.bf16.mxu0 %v1061_v22  ;;  %v352_v51 = vpop.f32.mrb[4].mxu1 }
 0x179   :  { %v354_v52 = vpop.f32.mrb[5].mxu1 }
 0x17c   :  { %v358_v53 = vpop.f32.mrb[6].mxu1 }
 0x17d   :  { %v886_v54 = vpack.c.bf16 %v358_v53, %v352_v51  ;;  %v360_v55 = vpop.f32.mrb[7].mxu1 }
 0x17e   :  { %760 = vmatmul.mubr.f32.vlgmr.msra.gmra.mrb[4].mxu0 %v200_v35  ;;  %v889_v56 = vpack.c.bf16 %v360_v55, %v354_v52 }
 0x17f   :  { %884 = vmatpush3.bf16.msra.mxu0 %v883_v34  ;;  %766 = vmatprep.mubr.msk.f32.mxu0 %vm1062_vm0, %v1063_v25 }
 0x180   :  { %885 = vmatprep.subr.bf16.mxu0 %v1061_v22 }
 0x251   :  { %v429_v43 = vpop.f32.mrb[4].mxu0 }
 0x252   :  { %v761_v44 = vpop.f32.mrb[5].mxu0  ;;  %v434_v45 = vsel %vm433_vm1, %v429_v43, -inf }
 0x253   :  { %435 = vmax.xlane.f32.xlu0 %v434_v45 }
 0x2e0   :  { %v436_v46 = vpop.xlane.xlu0 %435 }
 0x2e1   :  { %v437_v47 = vsub.f32 %v429_v43, %v436_v46 }
 0x2e3   :  { %v438_v48 = vmul.f32 1.442695, %v437_v47 }
 0x2e5   :  { %904 = vpow2.f32 %v438_v48 }
 0x2ef   :  { %v905_v49 = vpop.eup %904 }
 0x2f0   :  { %v440_v50 = vsel %vm433_vm1, %v905_v49, 0.0 }
 0x2f1   :  { %441 = vadd.xlane.f32.xlu0 %v440_v50 }
 0x37e   :  { %v442_v57 = vpop.xlane.xlu0 %441 }
 0x37f   :  { %906 = vrcp.f32 %v442_v57 }
 0x389   :  { %v907_v59 = vpop.eup %906 }
 0x38a   :  { %v445_v60 = vmul.f32 %v907_v59, %v905_v49 }
 0x38c   :  { %v448_v61 = vmul.f32 1.1111112, %v445_v60 }
 0x38e   :  { %v449_v62 = vsel %vm447_vm2, %v448_v61, 0.0 }
 0x38f   :  { %767 = vmatmul.mubr.msk.f32.vlgmr.msra.gmra.mrb[6].mxu0 %vm433_vm1, %v449_v62 }
 0x390   :  { %887 = vmatpush3.bf16.xpose.msra.mxu0 %v886_v54  ;;  %773 = vmatprep.mubr.msk.f32.mxu0 %vm1062_vm0, %v1063_v25 }
 0x391   :  { %888 = vmatprep.subr.bf16.mxu0 %v1061_v22 }
 0x397   :  { %774 = vmatmul.mubr.f32.vlgmr.msra.gmra.mrb[8].mxu0 %v201_v63 }
 0x398   :  { %890 = vmatpush3.bf16.msra.mxu0 %v889_v56  ;;  %780 = vmatprep.mubr.msk.f32.mxu0 %vm1062_vm0, %v1063_v25 }
 0x462   :  { %v519_v0 = vpop.f32.mrb[6].mxu0 }
 0x463   :  { %682 = vst [vmem:[#allocation11] sm:$0xff] %v519_v0  ;;  %v768_v1 = vpop.f32.mrb[7].mxu0 }
 0x46a   :  { %v589_v2 = vpop.f32.mrb[8].mxu0 }
 0x46b   :  { %v775_v3 = vpop.f32.mrb[9].mxu0  ;;  %v593_v4 = vsel %vm433_vm1, %v589_v2, -inf }
 0x46c   :  { %594 = vmax.xlane.f32.xlu1 %v593_v4 }
 0x4f9   :  { %v595_v5 = vpop.xlane.xlu1 %594 }
 0x4fa   :  { %v596_v6 = vsub.f32 %v589_v2, %v595_v5 }
 0x4fc   :  { %v597_v7 = vmul.f32 1.442695, %v596_v6 }
 0x4fe   :  { %908 = vpow2.f32 %v597_v7 }
 0x508   :  { %v909_v8 = vpop.eup %908 }
 0x509   :  { %v599_v9 = vsel %vm433_vm1, %v909_v8, 0.0 }
 0x50a   :  { %600 = vadd.xlane.f32.xlu1 %v599_v9 }
 0x597   :  { %v601_v10 = vpop.xlane.xlu1 %600 }
 0x598   :  { %910 = vrcp.f32 %v601_v10 }
 0x5a2   :  { %v911_v12 = vpop.eup %910 }
 0x5a3   :  { %v604_v13 = vmul.f32 %v911_v12, %v909_v8 }
 0x5a5   :  { %v607_v14 = vmul.f32 1.1111112, %v604_v13 }
 0x5a7   :  { %v608_v15 = vsel %vm606_vm3, %v607_v14, 0.0 }
 0x5a8   :  { %781 = vmatmul.mubr.msk.f32.vlgmr.msra.gmra.mrb[10].mxu0 %vm433_vm1, %v608_v15 }
 0x67b   :  { %v678_v16 = vpop.f32.mrb[10].mxu0 }
 0x67c   :  { %683 = vst [vmem:[#allocation11 + $0x8] sm:$0xff] %v678_v16  ;;  %v782_v17 = vpop.f32.mrb[11].mxu0 }
 0x67d   :  { %1033 = shalt.err (!%p1030_p2)
}
 0x67e   :  { %s1034_s9 = scalar_lea.hbm %s1204_s5, 256 }
 0x67f   :  { %p1035_p3 = scmp.ne.s32.totalorder %s1204_s5, %s1034_s9  ;;  %p1038_p4 = scmp.lt.u32.totalorder %s1034_s9, %s1204_s5 }
 0x681   :  { %p1040_p5 = pnand %p1038_p4, %p1035_p3 }
 0x683   :  { %1043 = shalt.err (!%p1040_p5)
}
 0x684   :  { %695 = dma.vmem_to_hbm [thread:$0]  %s690_s28, 256, %s1204_s5, [#allocation4], %s1057_s18, %s1057_s18, %s1058_s19  }
 0x685   :  { %1050 = dma.done.wait [#allocation4], 256  }
 0x686   :  { %1051 = vsyncadd [#allocation4], 4294967040 }
 0x687   :  { %699 = vsyncpa [#allocation3], 1 }
 0x688   :  { %700 = vsyncpa [#allocation6], 1 }
 0x689   :  { %701 = vsyncpa [#allocation9], 1 }
 0x68a   :  { %702 = vsyncpa [#allocation4], 1 }

</bundles_post_ra>
